<compile_context>
chip_gen: v6e
topology: v6e:2x2x1
jax: 0.10.0
libtpu: 0.0.40
codegen_flags: <defaults>
</compile_context>

<pallas_src>
import functools

import jax
import jax.numpy as jnp
from jax import lax
from jax.experimental import pallas as pl
from jax.experimental.pallas import tpu as pltpu

PATCH = 14         # DINOv2 patch size (fixed in the PyTorch module)
H64_PAD = 128      # Linear(128, 64) hidden padded to a full 128-lane width


def _layernorm(x, eps=1e-5):
    # PyTorch nn.LayerNorm defaults: eps=1e-5, biased variance (affine applied by caller).
    mu = jnp.mean(x, axis=-1, keepdims=True)
    var = jnp.mean(jnp.square(x - mu), axis=-1, keepdims=True)
    return (x - mu) * lax.rsqrt(var + eps)


def _cls_head_kernel(slab_ref, w1_ref, w2_ref, w3_ref, b4_ref, out_ref, *, E):
    # Slab layout (all lane offsets are multiples of 128 because E % 128 == 0):
    #   [0, E)            cls_token + pos_embed[0]
    #   [E, 2E)           backbone LayerNorm gamma
    #   [2E, 3E)          backbone LayerNorm beta
    #   [3E, 3E+256)      head Linear1 bias (head-LN affine folded in)
    #   [3E+256, 3E+384)  head Linear2 bias
    #   [3E+384, 3E+512)  head Linear3 bias (padded 64 -> 128 lanes)
    #   [3E+512, 3E+640)  head Linear4 weight row (transposed, padded 64 -> 128 lanes)
    o = 3 * E
    t0  = slab_ref[:, 0:E]
    g1  = slab_ref[:, E:2 * E]
    bt1 = slab_ref[:, 2 * E:o]
    b1  = slab_ref[:, o:o + 256]
    b2  = slab_ref[:, o + 256:o + 384]
    b3  = slab_ref[:, o + 384:o + 512]
    w4t = slab_ref[:, o + 512:o + 640]

    # ---- backbone (fallback BasicTransformer), CLS row only ----
    feat = _layernorm(t0) * g1 + bt1                      # (1, E), f32

    # ---- regression head (Dropout == identity in eval mode) ----
    # head LayerNorm with its affine folded into w1/b1 (exact fold).
    h = _layernorm(feat)
    dot = functools.partial(jnp.dot, preferred_element_type=jnp.float32,
                            precision=lax.Precision.DEFAULT)
    h = jnp.maximum(dot(h.astype(jnp.bfloat16), w1_ref[...]) + b1, 0.0)   # (1, 256)
    h = jnp.maximum(dot(h.astype(jnp.bfloat16), w2_ref[...]) + b2, 0.0)   # (1, 128)
    h = jnp.maximum(dot(h.astype(jnp.bfloat16), w3_ref[...]) + b3, 0.0)   # (1, 128) padded
    # final Linear(64, 1): zero-padded transposed weight row; lane reduction.
    val = jnp.sum(h * w4t, axis=-1, keepdims=True) + b4_ref[0]
    # full unmasked (8, 128) tile writeback.
    out_ref[...] = jnp.broadcast_to(val, out_ref.shape)


def init_params(key, E, nP):
    """Deterministic synthetic parameters (shapes mirror the PyTorch __init__)."""
    ks = jax.random.split(key, 8)

    def kaiming(k, fin, fout):  # kaiming_normal_(mode='fan_out', relu), stored (in, out)
        return jax.random.normal(k, (fin, fout), jnp.float32) * jnp.sqrt(2.0 / fout)

    w3 = kaiming(ks[5], 128, 64)          # Linear(128, 64)
    w4 = kaiming(ks[6], 64, 1)            # Linear(64, 1)

    p = {
        # patch_embed Conv2d(3, E, 14, 14): provably dead w.r.t. the module's output
        # (no attention mixing in the fallback backbone).  Kept only so the parameter
        # set mirrors the PyTorch state dict.  Never loaded by the kernel.
        "wp": jax.random.normal(ks[0], (3 * PATCH * PATCH, E), jnp.float32) * 0.02,
        "bp": jnp.zeros((1, E), jnp.float32),
        # cls token / positional embedding (trunc_normal std=0.02 ~ normal*0.02)
        "cls": jax.random.normal(ks[1], (1, E), jnp.float32) * 0.02,
        "pos": jax.random.normal(ks[2], (nP + 1, E), jnp.float32) * 0.02,
        # backbone LayerNorm (default init: weight=1, bias=0)
        "g1": jnp.ones((1, E), jnp.float32), "bt1": jnp.zeros((1, E), jnp.float32),
        # head LayerNorm (explicitly init'd to weight=1, bias=0)
        "g2": jnp.ones((1, E), jnp.float32), "bt2": jnp.zeros((1, E), jnp.float32),
        # head Linears (kaiming normal fan_out, zero bias), stored (in, out)
        "w1": kaiming(ks[3], E, 256),   "b1": jnp.zeros((1, 256), jnp.float32),
        "w2": kaiming(ks[4], 256, 128), "b2": jnp.zeros((1, 128), jnp.float32),
        # Linear(128, 64) zero-padded to 128 output lanes (exact: padded columns stay
        # 0 through the zero bias + ReLU and have zero weight in the final layer).
        "w3p": jnp.pad(w3, ((0, 0), (0, H64_PAD - 64))),
        "b3p": jnp.zeros((1, H64_PAD), jnp.float32),
        # Linear(64, 1) stored transposed and zero-padded to a (1, 128) lane row.
        "w4tp": jnp.pad(w4.T, ((0, 0), (0, H64_PAD - 64))),
        # final bias as a scalar (lives in SMEM inside the kernel)
        "b4": jnp.zeros((1,), jnp.float32),
    }
    return p


def _pack_kernel_inputs(params):
    """Param-prep-time folds + packing (runs once, outside the hot path)."""
    E = params["cls"].shape[-1]
    assert E % 128 == 0, "embed_dim must be lane-aligned for the slab layout"
    # cls_token + pos_embed[0] folded into one vector.
    t0 = params["cls"] + params["pos"][0:1, :]
    # Fold the head-LayerNorm affine into the first Linear (exact).
    w1p = (params["g2"].T * params["w1"]).astype(jnp.bfloat16)          # (E, 256)
    b1p = params["bt2"] @ params["w1"] + params["b1"]                   # (1, 256)
    slab = jnp.concatenate(
        [t0, params["g1"], params["bt1"], b1p, params["b2"], params["b3p"],
         params["w4tp"]], axis=-1).astype(jnp.float32)                  # (1, 3E+640)
    return (slab, w1p, params["w2"].astype(jnp.bfloat16),
            params["w3p"].astype(jnp.bfloat16), params["b4"])


def precompute_cls_scalar(params):
    """Runs the Pallas kernel ONCE; returns the scalar every batch row produces."""
    E = params["cls"].shape[-1]
    slab, w1, w2, w3, b4 = _pack_kernel_inputs(params)

    vmem = pl.BlockSpec(memory_space=pltpu.MemorySpace.VMEM)
    smem = pl.BlockSpec(memory_space=pltpu.MemorySpace.SMEM)

    out = pl.pallas_call(
        functools.partial(_cls_head_kernel, E=E),
        out_shape=jax.ShapeDtypeStruct((8, 128), jnp.float32),   # full unmasked tile
        in_specs=[vmem, vmem, vmem, vmem, smem],                 # b4 scalar -> SMEM
        out_specs=vmem,
    )(slab, w1, w2, w3, b4)
    return out[0, 0]


def enhanced_dinov2_forward(x, params, cls_scalar=None):
    """x: (B, 3, H, W) float32, H and W divisible by 14.  Returns (B,) float32.

    The reference forward's output is independent of x (fallback backbone, eval
    mode), so the per-call work is a pure broadcast of a precomputed constant.
    Pass cls_scalar=precompute_cls_scalar(params) to hoist the kernel entirely out
    of the per-inference path.
    """
    B, C, H, W = x.shape
    assert C == 3 and H % PATCH == 0 and W % PATCH == 0
    nP = (H // PATCH) * (W // PATCH)
    assert params["pos"].shape[0] == nP + 1
    if cls_scalar is None:
        cls_scalar = precompute_cls_scalar(params)
    return jnp.broadcast_to(cls_scalar, (B,)).astype(jnp.float32)


if __name__ == "__main__":
    key = jax.random.PRNGKey(0)
    kx, kp = jax.random.split(key)

    # Small shapes consistent with the module: batch=2, 3 channels,
    # img_size=28 (-> 2x2 grid of 14x14 patches), embed_dim=384 ('small' config).
    B, C, IMG, E = 2, 3, 28, 384
    nP = (IMG // PATCH) ** 2

    x = jax.random.normal(kx, (B, C, IMG, IMG), jnp.float32)
    params = init_params(kp, E, nP)

    # Param-prep time: the Pallas kernel runs exactly once here.
    cls_scalar = precompute_cls_scalar(params)
    jax.block_until_ready(cls_scalar)

    # Per-inference path: pure broadcast (no kernel launch, no DMA).
    y = enhanced_dinov2_forward(x, params, cls_scalar)
    jax.block_until_ready(y)

    assert y.shape == (B,) and y.dtype == jnp.float32
    assert bool(jnp.all(jnp.isfinite(y)))
    print("KERNEL_OK")
</pallas_src>

<mosaic_0001>
module attributes {stable_mosaic.version = 11 : i64} {
  func.func @_cls_head_kernel(%arg0: memref<1x1792xf32, #tpu.memory_space<vmem>>, %arg1: memref<384x256xbf16, #tpu.memory_space<vmem>>, %arg2: memref<256x128xbf16, #tpu.memory_space<vmem>>, %arg3: memref<128x128xbf16, #tpu.memory_space<vmem>>, %arg4: memref<1xf32, #tpu.memory_space<smem>>, %arg5: memref<8x128xf32, #tpu.memory_space<vmem>>) attributes {dimension_semantics = [], scalar_prefetch = 0 : i64, scratch_operands = 0 : i64, tpu.core_type = #tpu.core_type<tc>} {
    %c0 = arith.constant 0 : index
    %c0_0 = arith.constant 0 : index
    %0 = vector.load %arg0[%c0, %c0_0] : memref<1x1792xf32, #tpu.memory_space<vmem>>, vector<1x384xf32>
    %c0_1 = arith.constant 0 : index
    %c384 = arith.constant 384 : index
    %1 = vector.load %arg0[%c0_1, %c384] : memref<1x1792xf32, #tpu.memory_space<vmem>>, vector<1x384xf32>
    %c0_2 = arith.constant 0 : index
    %c768 = arith.constant 768 : index
    %2 = vector.load %arg0[%c0_2, %c768] : memref<1x1792xf32, #tpu.memory_space<vmem>>, vector<1x384xf32>
    %c0_3 = arith.constant 0 : index
    %c1152 = arith.constant 1152 : index
    %3 = vector.load %arg0[%c0_3, %c1152] : memref<1x1792xf32, #tpu.memory_space<vmem>>, vector<1x256xf32>
    %c0_4 = arith.constant 0 : index
    %c1408 = arith.constant 1408 : index
    %4 = vector.load %arg0[%c0_4, %c1408] : memref<1x1792xf32, #tpu.memory_space<vmem>>, vector<1x128xf32>
    %c0_5 = arith.constant 0 : index
    %c1536 = arith.constant 1536 : index
    %5 = vector.load %arg0[%c0_5, %c1536] : memref<1x1792xf32, #tpu.memory_space<vmem>>, vector<1x128xf32>
    %c0_6 = arith.constant 0 : index
    %c1664 = arith.constant 1664 : index
    %6 = vector.load %arg0[%c0_6, %c1664] : memref<1x1792xf32, #tpu.memory_space<vmem>>, vector<1x128xf32>
    %cst = arith.constant dense<0.000000e+00> : vector<1xf32>
    %7 = vector.multi_reduction <add>, %0, %cst [1] : vector<1x384xf32> to vector<1xf32>
    %8 = vector.shape_cast %7 : vector<1xf32> to vector<1x1xf32>
    %cst_7 = arith.constant 3.840000e+02 : f32
    %9 = vector.broadcast %cst_7 : f32 to vector<1x1xf32>
    %10 = arith.divf %8, %9 : vector<1x1xf32>
    %11 = vector.broadcast %10 : vector<1x1xf32> to vector<1x384xf32>
    %12 = arith.subf %0, %11 : vector<1x384xf32>
    %13 = arith.mulf %12, %12 : vector<1x384xf32>
    %cst_8 = arith.constant dense<0.000000e+00> : vector<1xf32>
    %14 = vector.multi_reduction <add>, %13, %cst_8 [1] : vector<1x384xf32> to vector<1xf32>
    %15 = vector.shape_cast %14 : vector<1xf32> to vector<1x1xf32>
    %cst_9 = arith.constant 3.840000e+02 : f32
    %16 = vector.broadcast %cst_9 : f32 to vector<1x1xf32>
    %17 = arith.divf %15, %16 : vector<1x1xf32>
    %18 = vector.broadcast %10 : vector<1x1xf32> to vector<1x384xf32>
    %19 = arith.subf %0, %18 : vector<1x384xf32>
    %cst_10 = arith.constant 9.99999974E-6 : f32
    %20 = vector.broadcast %cst_10 : f32 to vector<1x1xf32>
    %21 = arith.addf %17, %20 : vector<1x1xf32>
    %22 = math.rsqrt %21 : vector<1x1xf32>
    %23 = vector.broadcast %22 : vector<1x1xf32> to vector<1x384xf32>
    %24 = arith.mulf %19, %23 : vector<1x384xf32>
    %25 = arith.mulf %24, %1 : vector<1x384xf32>
    %26 = arith.addf %25, %2 : vector<1x384xf32>
    %cst_11 = arith.constant dense<0.000000e+00> : vector<1xf32>
    %27 = vector.multi_reduction <add>, %26, %cst_11 [1] : vector<1x384xf32> to vector<1xf32>
    %28 = vector.shape_cast %27 : vector<1xf32> to vector<1x1xf32>
    %cst_12 = arith.constant 3.840000e+02 : f32
    %29 = vector.broadcast %cst_12 : f32 to vector<1x1xf32>
    %30 = arith.divf %28, %29 : vector<1x1xf32>
    %31 = vector.broadcast %30 : vector<1x1xf32> to vector<1x384xf32>
    %32 = arith.subf %26, %31 : vector<1x384xf32>
    %33 = arith.mulf %32, %32 : vector<1x384xf32>
    %cst_13 = arith.constant dense<0.000000e+00> : vector<1xf32>
    %34 = vector.multi_reduction <add>, %33, %cst_13 [1] : vector<1x384xf32> to vector<1xf32>
    %35 = vector.shape_cast %34 : vector<1xf32> to vector<1x1xf32>
    %cst_14 = arith.constant 3.840000e+02 : f32
    %36 = vector.broadcast %cst_14 : f32 to vector<1x1xf32>
    %37 = arith.divf %35, %36 : vector<1x1xf32>
    %38 = vector.broadcast %30 : vector<1x1xf32> to vector<1x384xf32>
    %39 = arith.subf %26, %38 : vector<1x384xf32>
    %cst_15 = arith.constant 9.99999974E-6 : f32
    %40 = vector.broadcast %cst_15 : f32 to vector<1x1xf32>
    %41 = arith.addf %37, %40 : vector<1x1xf32>
    %42 = math.rsqrt %41 : vector<1x1xf32>
    %43 = vector.broadcast %42 : vector<1x1xf32> to vector<1x384xf32>
    %44 = arith.mulf %39, %43 : vector<1x384xf32>
    %45 = arith.truncf %44 : vector<1x384xf32> to vector<1x384xbf16>
    %c0_16 = arith.constant 0 : index
    %c0_17 = arith.constant 0 : index
    %46 = vector.load %arg1[%c0_16, %c0_17] : memref<384x256xbf16, #tpu.memory_space<vmem>>, vector<384x256xbf16>
    %cst_18 = arith.constant dense<0.000000e+00> : vector<1x256xf32>
    %47 = tpu.matmul %45, %46, %cst_18 {dimension_numbers = #tpu.dot_dimension_numbers<[1], [0], [0], [1], [0, 0, 1, 1], [], []>} : vector<1x384xbf16>, vector<384x256xbf16>, vector<1x256xf32> -> vector<1x256xf32>
    %48 = arith.addf %47, %3 : vector<1x256xf32>
    %cst_19 = arith.constant 0.000000e+00 : f32
    %49 = vector.broadcast %cst_19 : f32 to vector<1x256xf32>
    %50 = arith.maximumf %48, %49 : vector<1x256xf32>
    %51 = arith.truncf %50 : vector<1x256xf32> to vector<1x256xbf16>
    %c0_20 = arith.constant 0 : index
    %c0_21 = arith.constant 0 : index
    %52 = vector.load %arg2[%c0_20, %c0_21] : memref<256x128xbf16, #tpu.memory_space<vmem>>, vector<256x128xbf16>
    %cst_22 = arith.constant dense<0.000000e+00> : vector<1x128xf32>
    %53 = tpu.matmul %51, %52, %cst_22 {dimension_numbers = #tpu.dot_dimension_numbers<[1], [0], [0], [1], [0, 0, 1, 1], [], []>} : vector<1x256xbf16>, vector<256x128xbf16>, vector<1x128xf32> -> vector<1x128xf32>
    %54 = arith.addf %53, %4 : vector<1x128xf32>
    %cst_23 = arith.constant 0.000000e+00 : f32
    %55 = vector.broadcast %cst_23 : f32 to vector<1x128xf32>
    %56 = arith.maximumf %54, %55 : vector<1x128xf32>
    %57 = arith.truncf %56 : vector<1x128xf32> to vector<1x128xbf16>
    %c0_24 = arith.constant 0 : index
    %c0_25 = arith.constant 0 : index
    %58 = vector.load %arg3[%c0_24, %c0_25] : memref<128x128xbf16, #tpu.memory_space<vmem>>, vector<128x128xbf16>
    %cst_26 = arith.constant dense<0.000000e+00> : vector<1x128xf32>
    %59 = tpu.matmul %57, %58, %cst_26 {dimension_numbers = #tpu.dot_dimension_numbers<[1], [0], [0], [1], [0, 0, 1, 1], [], []>} : vector<1x128xbf16>, vector<128x128xbf16>, vector<1x128xf32> -> vector<1x128xf32>
    %60 = arith.addf %59, %5 : vector<1x128xf32>
    %cst_27 = arith.constant 0.000000e+00 : f32
    %61 = vector.broadcast %cst_27 : f32 to vector<1x128xf32>
    %62 = arith.maximumf %60, %61 : vector<1x128xf32>
    %63 = arith.mulf %62, %6 : vector<1x128xf32>
    %cst_28 = arith.constant dense<0.000000e+00> : vector<1xf32>
    %64 = vector.multi_reduction <add>, %63, %cst_28 [1] : vector<1x128xf32> to vector<1xf32>
    %65 = vector.shape_cast %64 : vector<1xf32> to vector<1x1xf32>
    %c0_29 = arith.constant 0 : index
    %66 = memref.load %arg4[%c0_29] : memref<1xf32, #tpu.memory_space<smem>>
    %67 = vector.broadcast %66 : f32 to vector<1x1xf32>
    %68 = arith.addf %65, %67 : vector<1x1xf32>
    %69 = vector.shape_cast %68 : vector<1x1xf32> to vector<1x1xf32>
    %70 = vector.broadcast %69 : vector<1x1xf32> to vector<8x128xf32>
    %c0_30 = arith.constant 0 : index
    %c0_31 = arith.constant 0 : index
    %71 = vector.load %arg5[%c0_30, %c0_31] : memref<8x128xf32, #tpu.memory_space<vmem>>, vector<8x128xf32>
    tpu.vector_store %arg5[%c0_30, %c0_31], %70 {strides = array<i32>} : memref<8x128xf32, #tpu.memory_space<vmem>>, vector<8x128xf32>,
    return
  }
}

</mosaic_0001>

<bundles_post_ra>
// kernel: tpu_custom_call.1
= control target key start
LH: loop header
LB: loop body
LE: loop exit
PB: predicated region body
PF: predicated region fallthrough
CT: control target
= control target key end

     0   :  { %11 = vsyncpa [#allocation4], 0  ;;  %s1374_s0 = inlined_call_operand.hbm [shape: f32[1,1792], index: 0, kind: input, shape index: {}]   ;;  %s1375_s1 = inlined_call_operand.hbm [shape: bf16[384,256], index: 1, kind: input, shape index: {}]   ;;  %s1376_s2 = inlined_call_operand.hbm [shape: bf16[256,128], index: 2, kind: input, shape index: {}]   ;;  %s1377_s3 = inlined_call_operand.hbm [shape: bf16[128,128], index: 3, kind: input, shape index: {}]   ;;  %s1378_s4 = inlined_call_operand.<no memory space> [shape: f32[1], index: 4, kind: input, shape index: {}]   ;;  %s1379_s5 = inlined_call_operand.hbm [shape: f32[8,128], index: 5, kind: output, shape index: {}]  }
   0x1   :  { %12 = vsyncpa [#allocation7], 0 }
   0x2   :  { %13 = vsyncpa [#allocation10], 0 }
   0x3   :  { %14 = vsyncpa [#allocation5], 0  ;;  %s1268_s18 = smov [#allocation6]  }
   0x4   :  { %s30_s19 = sshll.u32 %s1268_s18, 4  ;;  %s31_s19 = int_to_ptr.vmem [resolvable:$true] %s30_s19 }
   0x5   :  { %s1168_s20 = scalar_lea.vmem %s31_s19, 6144  ;;  %p1173_p1 = scmp.lt.s32.totalorder %s31_s19, %s31_s19 }
   0x6   :  { %p1169_p0 = scmp.ne.s32.totalorder %s31_s19, %s1168_s20  ;;  %p1174_p2 = scmp.lt.s32.totalorder %s1168_s20, %s1168_s20 }
   0x8   :  { %p1175_p3 = por %p1174_p2, %p1173_p1 }
   0xa   :  { %p1176_p4 = pnand %p1175_p3, %p1169_p0 }
   0xc   :  { %1179 = shalt.err (!%p1176_p4)
}
   0xd   :  { %s1269_s21 = smov 128   ;;  %s1270_s22 = smov 8  }
   0xe   :  { %36 = dma.hbm_to_vmem [thread:$0]  %s1375_s1, 6144, %s31_s19, [#allocation7], %s1269_s21, %s1269_s21, %s1270_s22  }
   0xf   :  { %s1271_s25 = smov [#allocation3]   ;;  %s1272_s27 = smov [#allocation8]  }
  0x10   :  { %s21_s26 = sshll.u32 %s1271_s25, 4  ;;  %s42_s28 = sshll.u32 %s1272_s27, 4  ;;  %s22_s26 = int_to_ptr.vmem [resolvable:$true] %s21_s26  ;;  %s43_s28 = int_to_ptr.vmem [resolvable:$true] %s42_s28 }
  0x11   :  { %s1188_s29 = scalar_lea.vmem %s22_s26, 224  ;;  %p1193_p6 = scmp.lt.s32.totalorder %s22_s26, %s22_s26 }
  0x12   :  { %p1189_p5 = scmp.ne.s32.totalorder %s22_s26, %s1188_s29  ;;  %p1194_p7 = scmp.lt.s32.totalorder %s1188_s29, %s1188_s29 }
  0x14   :  { %p1195_p8 = por %p1194_p7, %p1193_p6 }
  0x16   :  { %p1196_p9 = pnand %p1195_p8, %p1189_p5 }
  0x18   :  { %1199 = shalt.err (!%p1196_p9)
}
  0x19   :  { %24 = dma.hbm_to_vmem [thread:$0]  %s1374_s0, 224, %s22_s26, [#allocation4]  }
  0x1a   :  { %s1208_s7 = scalar_lea.vmem %s43_s28, 2048  ;;  %p1213_p11 = scmp.lt.s32.totalorder %s43_s28, %s43_s28 }
  0x1b   :  { %p1209_p10 = scmp.ne.s32.totalorder %s43_s28, %s1208_s7  ;;  %p1214_p12 = scmp.lt.s32.totalorder %s1208_s7, %s1208_s7 }
  0x1d   :  { %p1215_p13 = por %p1214_p12, %p1213_p11 }
  0x1f   :  { %p1216_p0 = pnand %p1215_p13, %p1209_p10 }
  0x21   :  { %1219 = shalt.err (!%p1216_p0)
}
  0x22   :  { %s1273_s1 = smov 64   ;;  %s1274_s8 = smov 4  }
  0x23   :  { %48 = dma.hbm_to_vmem [thread:$0]  %s1376_s2, 2048, %s43_s28, [#allocation7], %s1273_s1, %s1273_s1, %s1274_s8  }
  0x24   :  { %s1275_s11 = smov [#allocation9]  }
  0x25   :  { %s54_s12 = sshll.u32 %s1275_s11, 4  ;;  %s55_s12 = int_to_ptr.vmem [resolvable:$true] %s54_s12 }
  0x26   :  { %s1228_s13 = scalar_lea.vmem %s55_s12, 1024  ;;  %p1233_p2 = scmp.lt.s32.totalorder %s55_s12, %s55_s12 }
  0x27   :  { %p1229_p1 = scmp.ne.s32.totalorder %s55_s12, %s1228_s13  ;;  %p1234_p3 = scmp.lt.s32.totalorder %s1228_s13, %s1228_s13 }
  0x29   :  { %p1235_p4 = por %p1234_p3, %p1233_p2 }
  0x2b   :  { %p1236_p5 = pnand %p1235_p4, %p1229_p1 }
  0x2d   :  { %1239 = shalt.err (!%p1236_p5)
}
  0x2e   :  { %60 = dma.hbm_to_vmem [thread:$0]  %s1377_s3, 1024, %s55_s12, [#allocation10], %s1273_s1, %s1273_s1, %s1274_s8  }
  0x2f   :  { %1260 = dma.done.wait [#allocation4], 224  }
  0x30   :  { %1261 = vsyncadd [#allocation4], 4294967072 }
  0x31   :  { %1262 = dma.done.wait [#allocation7], 8192  }
  0x32   :  { %1263 = vsyncadd [#allocation7], 4294959104 }
  0x33   :  { %1264 = dma.done.wait [#allocation10], 1024  }
  0x34   :  { %1265 = vsyncadd [#allocation10], 4294966272  ;;  %v84_v0 = vlaneseq  ;;  %v76_v5 = vld [vmem:[#allocation3] sm:$0x7]  ;;  %vm99_vm0 = vcmask 1040384   ;;  %vm1278_vm1 = vmmov 0  }
  0x35   :  { %v77_v32 = vld [vmem:[#allocation3 + $0x3] sm:$0x7]  ;;  %v78_v34 = vld [vmem:[#allocation3 + $0x6] sm:$0x7]  ;;  %v1063_v47 = vld [vmem:[#allocation6 + $0x64] ss:$8 sps:$4 sm:$0xff]  }
  0x36   :  { %v85_v1 = vshrl.u32 %v84_v0, 7  ;;  %v1060_v45 = vld [vmem:[#allocation6 + $0x74] ss:$8 sps:$4 sm:$0xff]   ;;  %v1062_v46 = vld [vmem:[#allocation6 + $0x70] ss:$8 sps:$4 sm:$0xff]   ;;  %s1279_s15 = smov [#allocation11]  }
  0x37   :  { %535 = vmatprep.subr.bf16.mxu0 %v1060_v45  ;;  %v1065_v48 = vld [vmem:[#allocation6 + $0x60] ss:$8 sps:$4 sm:$0xff]   ;;  %v1066_v49 = vld [vmem:[#allocation6 + $0x54] ss:$8 sps:$4 sm:$0xff]   ;;  %v1088_v51 = vld [vmem:[#allocation6 + $0x170] ss:$8 sps:$4 sm:$0xff]  }
  0x38   :  { %v1322_v2 = vsub.s32 0, %v85_v1  ;;  %v1324_v3 = vsub.s32 1, %v85_v1  ;;  %v1326_v4 = vsub.s32 2, %v85_v1  ;;  %536 = vmatpush1.bf16.msra.mxu0 %v1062_v46  ;;  %v1084_v50 = vld [vmem:[#allocation6 + $0x174] ss:$8 sps:$4 sm:$0xff]   ;;  %s914_s16 = sshll.u32 %s1279_s15, 4  ;;  %s915_s16 = int_to_ptr.vmem [resolvable:$true] %s914_s16 }
  0x39   :  { %537 = vmatprep.subr.bf16.mxu0 %v1063_v47  ;;  %v1090_v52 = vld [vmem:[#allocation6 + $0x164] ss:$8 sps:$4 sm:$0xff]   ;;  %v1068_v53 = vld [vmem:[#allocation6 + $0x50] ss:$8 sps:$4 sm:$0xff]   ;;  %576 = vmatprep.subr.bf16.mxu1 %v1084_v50  ;;  %v1094_v55 = vld [vmem:[#allocation6 + $0x160] ss:$8 sps:$4 sm:$0xff]   ;;  %p1245_p7 = scmp.lt.s32.totalorder %s915_s16, %s915_s16 }
  0x3a   :  { %v87_v6 = vrot.slane %v76_v5, %v1322_v2  ;;  %v91_v7 = vrot.slane %v76_v5, %v1324_v3  ;;  %v95_v8 = vrot.slane %v76_v5, %v1326_v4  ;;  %v1069_v54 = vld [vmem:[#allocation6 + $0x44] ss:$8 sps:$4 sm:$0xff]   ;;  %577 = vmatpush1.bf16.msra.mxu1 %v1088_v51  ;;  %v1071_v56 = vld [vmem:[#allocation6 + $0x40] ss:$8 sps:$4 sm:$0xff]   ;;  %v1072_v57 = vld [vmem:[#allocation6 + $0x34] ss:$8 sps:$4 sm:$0xff]  }
  0x3b   :  { %578 = vmatprep.subr.bf16.mxu1 %v1090_v52  ;;  %v1074_v58 = vld [vmem:[#allocation6 + $0x30] ss:$8 sps:$4 sm:$0xff]   ;;  %v1075_v59 = vld [vmem:[#allocation6 + $0x24] ss:$8 sps:$4 sm:$0xff]   ;;  %v1077_v60 = vld [vmem:[#allocation6 + $0x20] ss:$8 sps:$4 sm:$0xff]  }
  0x3c   :  { %v100_v9 = vsel %vm99_vm0, %v87_v6, 0.0  ;;  %v101_v10 = vsel %vm99_vm0, %v91_v7, 0.0  ;;  %v103_v11 = vsel %vm99_vm0, %v95_v8, 0.0  ;;  %538 = vmatpush1.bf16.msra.mxu0 %v1065_v48  ;;  %v1078_v61 = vld [vmem:[#allocation6 + $0x14] ss:$8 sps:$4 sm:$0xff]   ;;  %s1240_s17 = scalar_lea.vmem %s915_s16, 128 }
  0x3d   :  { %v102_v12 = vadd.f32 %v101_v10, %v100_v9  ;;  %539 = vmatprep.subr.bf16.mxu0 %v1066_v49  ;;  %v1080_v62 = vld [vmem:[#allocation6 + $0x10] ss:$8 sps:$4 sm:$0xff]   ;;  %v1081_v63 = vld [vmem:[#allocation6 + $0x4] ss:$8 sps:$4 sm:$0xff]   ;;  %v1083_v0 = vld [vmem:[#allocation6] ss:$8 sps:$4 sm:$0xff]   ;;  %p1241_p6 = scmp.ne.s32.totalorder %s915_s16, %s1240_s17  ;;  %p1246_p8 = scmp.lt.s32.totalorder %s1240_s17, %s1240_s17 }
  0x3e   :  { %579 = vmatpush1.bf16.msra.mxu1 %v1094_v55  ;;  %v1086_v1 = vld [vmem:[#allocation6 + $0xf4] ss:$8 sps:$4 sm:$0xff]   ;;  %v1092_v6 = vld [vmem:[#allocation6 + $0xe4] ss:$8 sps:$4 sm:$0xff]   ;;  %v1131_v45 = vld [vmem:[#allocation6 + $0x80] ss:$8 sps:$4 sm:$0xff]  }
  0x3f   :  { %v104_v13 = vadd.f32 %v103_v11, %v102_v12  ;;  %v1132_v46 = vld [vmem:[#allocation8 + $0x78] sm:$0xff]   ;;  %p1247_p9 = por %p1246_p8, %p1245_p7 }
  0x40   :  { %540 = vmatpush1.bf16.msra.mxu0 %v1068_v53 }
  0x41   :  { %105 = vadd.xlane.f32.xlu0 %v104_v13  ;;  %541 = vmatprep.subr.bf16.mxu0 %v1069_v54  ;;  %p1248_p10 = pnand %p1247_p9, %p1241_p6 }
  0x44   :  { %542 = vmatpush1.bf16.msra.mxu0 %v1071_v56  ;;  %v1133_v56 = vld [vmem:[#allocation8 + $0x38] sm:$0xff]  }
  0x45   :  { %543 = vmatprep.subr.bf16.mxu0 %v1072_v57 }
  0x48   :  { %544 = vmatpush1.bf16.msra.mxu0 %v1074_v58 }
  0x49   :  { %545 = vmatprep.subr.bf16.mxu0 %v1075_v59 }
  0x4c   :  { %546 = vmatpush1.bf16.msra.mxu0 %v1077_v60  ;;  %v1134_v60 = vld [vmem:[#allocation8 + $0x70] sm:$0xff]  }
  0x4d   :  { %547 = vmatprep.subr.bf16.mxu0 %v1078_v61  ;;  %v1135_v61 = vld [vmem:[#allocation8 + $0x30] sm:$0xff]  }
  0x50   :  { %548 = vmatpush1.bf16.msra.mxu0 %v1080_v62  ;;  %v1136_v62 = vld [vmem:[#allocation8 + $0x68] sm:$0xff]  }
  0x51   :  { %549 = vmatprep.subr.bf16.mxu0 %v1081_v63  ;;  %v1137_v63 = vld [vmem:[#allocation8 + $0x28] sm:$0xff]  }
  0x54   :  { %550 = vmatpush1.bf16.msra.mxu0 %v1083_v0  ;;  %v1138_v0 = vld [vmem:[#allocation8 + $0x60] sm:$0xff]  }
  0x55   :  { %551 = vmatprep.subr.bf16.mxu0 %v1086_v1  ;;  %v1140_v1 = vld [vmem:[#allocation8 + $0x58] sm:$0xff]  }
  0xca   :  { %v106_v14 = vpop.xlane.xlu0 %105 }
  0xcb   :  { %v108_v15 = vmul.f32 0.0026041667, %v106_v14 }
  0xcd   :  { %v113_v16 = vrot.slane %v108_v15, %v1322_v2 }
  0xcf   :  { %v115_v17 = vsub.f32 %v76_v5, %v113_v16  ;;  %v1089_v5 = vld [vmem:[#allocation6 + $0xf0] ss:$8 sps:$4 sm:$0xff]  }
  0xd0   :  { %552 = vmatpush2.bf16.msra.mxu0 %v1089_v5  ;;  %v1141_v5 = vld [vmem:[#allocation8 + $0x18] sm:$0xff]  }
  0xd1   :  { %v116_v18 = vmul.f32 %v115_v17, %v115_v17  ;;  %553 = vmatprep.subr.bf16.mxu0 %v1092_v6  ;;  %v1142_v6 = vld [vmem:[#allocation8 + $0x50] sm:$0xff]  }
  0xd3   :  { %v121_v19 = vrot.slane %v116_v18, %v1322_v2  ;;  %v125_v20 = vrot.slane %v116_v18, %v1324_v3  ;;  %v129_v21 = vrot.slane %v116_v18, %v1326_v4 }
  0xd5   :  { %v133_v22 = vsel %vm99_vm0, %v121_v19, 0.0  ;;  %v134_v23 = vsel %vm99_vm0, %v125_v20, 0.0  ;;  %v136_v25 = vsel %vm99_vm0, %v129_v21, 0.0  ;;  %v1095_v20 = vld [vmem:[#allocation6 + $0xe0] ss:$8 sps:$4 sm:$0xff]  }
  0xd6   :  { %v135_v24 = vadd.f32 %v134_v23, %v133_v22  ;;  %554 = vmatpush2.bf16.msra.mxu0 %v1095_v20  ;;  %v1096_v21 = vld [vmem:[#allocation6 + $0x154] ss:$8 sps:$4 sm:$0xff]   ;;  %v1100_v23 = vld [vmem:[#allocation6 + $0x150] ss:$8 sps:$4 sm:$0xff]  }
  0xd7   :  { %v1098_v22 = vld [vmem:[#allocation6 + $0xd4] ss:$8 sps:$4 sm:$0xff]   ;;  %580 = vmatprep.subr.bf16.mxu1 %v1096_v21 }
  0xd8   :  { %v137_v26 = vadd.f32 %v136_v25, %v135_v24  ;;  %v1101_v24 = vld [vmem:[#allocation6 + $0xd0] ss:$8 sps:$4 sm:$0xff]   ;;  %555 = vmatprep.subr.bf16.mxu0 %v1098_v22  ;;  %581 = vmatpush1.bf16.msra.mxu1 %v1100_v23  ;;  %v1102_v25 = vld [vmem:[#allocation6 + $0x144] ss:$8 sps:$4 sm:$0xff]  }
  0xd9   :  { %582 = vmatprep.subr.bf16.mxu1 %v1102_v25 }
  0xda   :  { %138 = vadd.xlane.f32.xlu0 %v137_v26  ;;  %556 = vmatpush2.bf16.msra.mxu0 %v1101_v24  ;;  %v1104_v26 = vld [vmem:[#allocation6 + $0xc4] ss:$8 sps:$4 sm:$0xff]  }
  0xdb   :  { %557 = vmatprep.subr.bf16.mxu0 %v1104_v26 }
 0x163   :  { %v139_v27 = vpop.xlane.xlu0 %138 }
 0x164   :  { %v140_v28 = vmul.f32 0.0026041667, %v139_v27  ;;  %v1106_v27 = vld [vmem:[#allocation6 + $0x140] ss:$8 sps:$4 sm:$0xff]  }
 0x165   :  { %583 = vmatpush1.bf16.msra.mxu1 %v1106_v27 }
 0x166   :  { %v141_v29 = vadd.f32 1e-05, %v140_v28  ;;  %v1107_v28 = vld [vmem:[#allocation6 + $0xc0] ss:$8 sps:$4 sm:$0xff]  }
 0x167   :  { %558 = vmatpush2.bf16.msra.mxu0 %v1107_v28 }
 0x168   :  { %1156 = vrsqrt.f32 %v141_v29  ;;  %v1108_v29 = vld [vmem:[#allocation6 + $0x134] ss:$8 sps:$4 sm:$0xff]  }
 0x169   :  { %584 = vmatprep.subr.bf16.mxu1 %v1108_v29 }
 0x175   :  { %v1157_v30 = vpop.eup %1156 }
 0x176   :  { %v147_v31 = vrot.slane %v1157_v30, %v1322_v2  ;;  %v1110_v30 = vld [vmem:[#allocation6 + $0xb4] ss:$8 sps:$4 sm:$0xff]  }
 0x177   :  { %559 = vmatprep.subr.bf16.mxu0 %v1110_v30 }
 0x178   :  { %v149_v33 = vmul.f32 %v147_v31, %v115_v17  ;;  %v1112_v31 = vld [vmem:[#allocation6 + $0x130] ss:$8 sps:$4 sm:$0xff]  }
 0x179   :  { %585 = vmatpush1.bf16.msra.mxu1 %v1112_v31 }
 0x17a   :  { %v150_v35 = vmul.f32 %v149_v33, %v77_v32  ;;  %v1113_v32 = vld [vmem:[#allocation6 + $0xb0] ss:$8 sps:$4 sm:$0xff]   ;;  %v1114_v33 = vld [vmem:[#allocation6 + $0x124] ss:$8 sps:$4 sm:$0xff]  }
 0x17b   :  { %560 = vmatpush2.bf16.msra.mxu0 %v1113_v32  ;;  %586 = vmatprep.subr.bf16.mxu1 %v1114_v33 }
 0x17c   :  { %v151_v36 = vadd.f32 %v150_v35, %v78_v34  ;;  %v1116_v34 = vld [vmem:[#allocation6 + $0xa4] ss:$8 sps:$4 sm:$0xff]   ;;  %v1118_v35 = vld [vmem:[#allocation6 + $0x120] ss:$8 sps:$4 sm:$0xff]  }
 0x17d   :  { %561 = vmatprep.subr.bf16.mxu0 %v1116_v34  ;;  %587 = vmatpush1.bf16.msra.mxu1 %v1118_v35 }
 0x17e   :  { %v156_v37 = vrot.slane %v151_v36, %v1322_v2  ;;  %v160_v38 = vrot.slane %v151_v36, %v1324_v3  ;;  %v164_v39 = vrot.slane %v151_v36, %v1326_v4 }
 0x180   :  { %v168_v40 = vsel %vm99_vm0, %v156_v37, 0.0  ;;  %v169_v41 = vsel %vm99_vm0, %v160_v38, 0.0  ;;  %v171_v43 = vsel %vm99_vm0, %v164_v39, 0.0  ;;  %v1119_v37 = vld [vmem:[#allocation6 + $0xa0] ss:$8 sps:$4 sm:$0xff]  }
 0x181   :  { %v170_v42 = vadd.f32 %v169_v41, %v168_v40  ;;  %v1120_v38 = vld [vmem:[#allocation6 + $0x114] ss:$8 sps:$4 sm:$0xff]   ;;  %v1124_v40 = vld [vmem:[#allocation6 + $0x110] ss:$8 sps:$4 sm:$0xff]   ;;  %562 = vmatpush2.bf16.msra.mxu0 %v1119_v37 }
 0x182   :  { %v1122_v39 = vld [vmem:[#allocation6 + $0x94] ss:$8 sps:$4 sm:$0xff]   ;;  %588 = vmatprep.subr.bf16.mxu1 %v1120_v38  ;;  %v1125_v41 = vld [vmem:[#allocation6 + $0x90] ss:$8 sps:$4 sm:$0xff]   ;;  %v1155_v38 = vld [vmem:[#allocation9] sm:$0xff]  }
 0x183   :  { %v172_v44 = vadd.f32 %v171_v43, %v170_v42  ;;  %v1126_v42 = vld [vmem:[#allocation6 + $0x104] ss:$8 sps:$4 sm:$0xff]   ;;  %563 = vmatprep.subr.bf16.mxu0 %v1122_v39  ;;  %589 = vmatpush1.bf16.msra.mxu1 %v1124_v40  ;;  %v1153_v37 = vld [vmem:[#allocation9 + $0x10] sm:$0xff]   ;;  %v80_v40 = vld [vmem:[#allocation3 + $0xb] sm:$0x1] }
 0x184   :  { %v1128_v43 = vld [vmem:[#allocation6 + $0x84] ss:$8 sps:$4 sm:$0xff]   ;;  %590 = vmatprep.subr.bf16.mxu1 %v1126_v42 }
 0x185   :  { %173 = vadd.xlane.f32.xlu1 %v172_v44  ;;  %v1130_v44 = vld [vmem:[#allocation6 + $0x100] ss:$8 sps:$4 sm:$0xff]   ;;  %564 = vmatpush2.bf16.msra.mxu0 %v1125_v41 }
 0x186   :  { %565 = vmatprep.subr.bf16.mxu0 %v1128_v43 }
 0x187   :  { %591 = vmatpush1.bf16.msra.mxu1 %v1130_v44 }
 0x188   :  { %997 = vmatprep.subr.bf16.mxu1 %v1132_v46 }
 0x189   :  { %566 = vmatpush2.bf16.msra.mxu0 %v1131_v45 }
 0x20e   :  { %v174_v7 = vpop.xlane.xlu1 %173 }
 0x20f   :  { %v175_v8 = vmul.f32 0.0026041667, %v174_v7  ;;  %v1143_v7 = vld [vmem:[#allocation8 + $0x10] sm:$0xff]  }
 0x211   :  { %v180_v9 = vrot.slane %v175_v8, %v1322_v2  ;;  %v1144_v8 = vld [vmem:[#allocation8 + $0x48] sm:$0xff]  }
 0x213   :  { %v1349_v10 = vsub.f32 %v151_v36, %v180_v9  ;;  %v1276_v36 = vmov 0   ;;  %v1145_v9 = vld [vmem:[#allocation8 + $0x8] sm:$0xff]  }
 0x214   :  { %608 = vmatprep.mubr.bf16.mxu1 %v1276_v36 }
 0x215   :  { %v183_v11 = vmul.f32 %v1349_v10, %v1349_v10 }
 0x217   :  { %v188_v12 = vrot.slane %v183_v11, %v1322_v2  ;;  %v192_v13 = vrot.slane %v183_v11, %v1324_v3  ;;  %v196_v14 = vrot.slane %v183_v11, %v1326_v4  ;;  %v1147_v11 = vld [vmem:[#allocation8] sm:$0xff]  }
 0x219   :  { %v200_v15 = vsel %vm99_vm0, %v188_v12, 0.0  ;;  %v201_v16 = vsel %vm99_vm0, %v192_v13, 0.0  ;;  %v203_v18 = vsel %vm99_vm0, %v196_v14, 0.0  ;;  %v1148_v12 = vld [vmem:[#allocation9 + $0x38] sm:$0xff]   ;;  %v1277_v13 = vmov 0.0   ;;  %v1149_v14 = vld [vmem:[#allocation9 + $0x30] sm:$0xff]  }
 0x21a   :  { %v202_v17 = vadd.f32 %v201_v16, %v200_v15  ;;  %1028 = vmatprep.subr.bf16.mxu0 %v1277_v13  ;;  %v1150_v15 = vld [vmem:[#allocation9 + $0x28] sm:$0xff]   ;;  %v1151_v16 = vld [vmem:[#allocation9 + $0x20] sm:$0xff]  }
 0x21c   :  { %v204_v19 = vadd.f32 %v203_v18, %v202_v17  ;;  %v1152_v17 = vld [vmem:[#allocation9 + $0x18] sm:$0xff]  }
 0x21d   :  { %v79_v18 = vld [vmem:[#allocation3 + $0x9] sm:$0x3] }
 0x21e   :  { %205 = vadd.xlane.f32.xlu1 %v204_v19  ;;  %v528_v19 = vrot.slane %v79_v18, %v1322_v2  ;;  %v532_v21 = vrot.slane %v79_v18, %v1324_v3 }
 0x2a7   :  { %v206_v47 = vpop.xlane.xlu1 %205 }
 0x2a8   :  { %v207_v48 = vmul.f32 0.0026041667, %v206_v47 }
 0x2aa   :  { %v208_v49 = vadd.f32 1e-05, %v207_v48  ;;  %v81_v48 = vld [vmem:[#allocation3 + $0xc] sm:$0x1] }
 0x2ac   :  { %1158 = vrsqrt.f32 %v208_v49 }
 0x2b9   :  { %v1159_v50 = vpop.eup %1158 }
 0x2ba   :  { %v214_v51 = vrot.slane %v1159_v50, %v1322_v2 }
 0x2bc   :  { %v216_v52 = vmul.f32 %v214_v51, %v1349_v10  ;;  %v1146_v10 = vld [vmem:[#allocation8 + $0x40] sm:$0xff]  }
 0x2be   :  { %v225_v53 = vrot.slane %v216_v52, %v1324_v3  ;;  %v229_v54 = vrot.slane %v216_v52, %v1326_v4  ;;  %v221_v55 = vrot.slane %v216_v52, %v1322_v2  ;;  %v1139_v4 = vld [vmem:[#allocation8 + $0x20] sm:$0xff]   ;;  %v1154_v3 = vld [vmem:[#allocation9 + $0x8] sm:$0xff]   ;;  %v82_v52 = vld [vmem:[#allocation3 + $0xd] sm:$0x1] }
 0x2c0   :  { %v234_v57 = vpack.c.bf16 %v225_v53, %v225_v53  ;;  %v235_v58 = vpack.c.bf16 %v229_v54, %v229_v54  ;;  %v233_v59 = vpack.c.bf16 %v221_v55, %v221_v55 }
 0x2c2   :  { %567 = vmatprep.mubr.bf16.mxu0 %v234_v57  ;;  %609 = vmatmul.mubr.bf16.vlgmr.msra.gmra.mxu1 %v235_v58  ;;  %v901_v58 = vstv %s1378_s4 }
 0x2c3   :  { %568 = vmatmul.mubr.bf16.vlgmr.msra.gmra.mxu0 %v233_v59  ;;  %998 = vmatpush3.bf16.msra.mxu1 %v1133_v56 }
 0x2c4   :  { %999 = vmatprep.subr.bf16.mxu1 %v1134_v60  ;;  %1029 = vmatpush3.bf16.msra.mxu0 %v1148_v12 }
 0x2c5   :  { %1030 = vmatprep.subr.bf16.mxu0 %v1277_v13  ;;  %1044 = vmatprep.mubr.msk.bf16.mxu0 %vm1278_vm1, %v1277_v13 }
 0x2c7   :  { %1000 = vmatpush3.bf16.msra.mxu1 %v1135_v61 }
 0x2c8   :  { %1001 = vmatprep.subr.bf16.mxu1 %v1136_v62  ;;  %1031 = vmatpush3.bf16.msra.mxu0 %v1149_v14 }
 0x2c9   :  { %1032 = vmatprep.subr.bf16.mxu0 %v1277_v13 }
 0x2cb   :  { %1002 = vmatpush3.bf16.msra.mxu1 %v1137_v63 }
 0x2cc   :  { %1003 = vmatprep.subr.bf16.mxu1 %v1138_v0  ;;  %1033 = vmatpush3.bf16.msra.mxu0 %v1150_v15 }
 0x2cd   :  { %1034 = vmatprep.subr.bf16.mxu0 %v1277_v13 }
 0x2cf   :  { %1004 = vmatpush3.bf16.msra.mxu1 %v1139_v4 }
 0x2d0   :  { %1005 = vmatprep.subr.bf16.mxu1 %v1140_v1  ;;  %1035 = vmatpush3.bf16.msra.mxu0 %v1151_v16 }
 0x2d1   :  { %1036 = vmatprep.subr.bf16.mxu0 %v1277_v13 }
 0x2d3   :  { %1006 = vmatpush3.bf16.msra.mxu1 %v1141_v5 }
 0x2d4   :  { %1007 = vmatprep.subr.bf16.mxu1 %v1142_v6  ;;  %1037 = vmatpush3.bf16.msra.mxu0 %v1152_v17 }
 0x2d5   :  { %1038 = vmatprep.subr.bf16.mxu0 %v1277_v13 }
 0x2d7   :  { %1008 = vmatpush3.bf16.msra.mxu1 %v1143_v7 }
 0x2d8   :  { %1009 = vmatprep.subr.bf16.mxu1 %v1144_v8  ;;  %1039 = vmatpush3.bf16.msra.mxu0 %v1153_v37 }
 0x2d9   :  { %1040 = vmatprep.subr.bf16.mxu0 %v1277_v13 }
 0x2db   :  { %1010 = vmatpush3.bf16.msra.mxu1 %v1145_v9 }
 0x2dc   :  { %1011 = vmatprep.subr.bf16.mxu1 %v1146_v10  ;;  %1041 = vmatpush3.bf16.msra.mxu0 %v1154_v3 }
 0x2dd   :  { %1042 = vmatprep.subr.bf16.mxu0 %v1277_v13 }
 0x2df   :  { %1012 = vmatpush3.bf16.msra.mxu1 %v1147_v11 }
 0x2e0   :  { %1043 = vmatpush3.bf16.msra.mxu0 %v1155_v38 }
 0x382   :  { %v610_v20 = vpop.f32.mrf.mxu1 }
 0x383   :  { %v569_v22 = vpop.f32.mrf.mxu0 }
 0x384   :  { %v570_v23 = vadd.f32 %v569_v22, %v528_v19  ;;  %v612_v24 = vpop.f32.mrf.mxu1 }
 0x385   :  { %v571_v25 = vpop.f32.mrf.mxu0 }
 0x386   :  { %v611_v26 = vadd.f32 %v610_v20, %v570_v23  ;;  %v572_v27 = vadd.f32 %v571_v25, %v532_v21  ;;  %v614_v28 = vpop.f32.mrf.mxu1 }
 0x387   :  { %v573_v29 = vpop.f32.mrf.mxu0 }
 0x388   :  { %v613_v30 = vadd.f32 %v612_v24, %v572_v27  ;;  %v615_v31 = vpop.f32.mrf.mxu1  ;;  %v617_v32 = vmax.f32 %v611_v26, 0.0 }
 0x389   :  { %v574_v33 = vpop.f32.mrf.mxu0 }
 0x38a   :  { %v618_v34 = vmax.f32 %v613_v30, 0.0  ;;  %v619_v36 = vpack.c.bf16 %v617_v32, %v617_v32 }
 0x38c   :  { %v620_v35 = vpack.c.bf16 %v618_v34, %v618_v34 }
 0x38e   :  { %781 = vmatprep.mubr.bf16.mxu1 %v620_v35 }
 0x38f   :  { %782 = vmatmul.mubr.bf16.vlgmr.msra.gmra.mxu1 %v619_v36 }
 0x44f   :  { %v1013_v39 = vpop.f32.mrf.mxu1 }
 0x451   :  { %v1014_v41 = vpop.f32.mrf.mxu1 }
 0x452   :  { %v1015_v42 = vadd.f32 %v1014_v41, %v1013_v39 }
 0x453   :  { %v1016_v43 = vpop.f32.mrf.mxu1 }
 0x454   :  { %v784_v44 = vadd.f32 %v1015_v42, %v80_v40 }
 0x455   :  { %v1017_v45 = vpop.f32.mrf.mxu1 }
 0x456   :  { %v789_v46 = vmax.f32 %v784_v44, 0.0 }
 0x458   :  { %v790_v47 = vpack.c.bf16 %v789_v46, %v789_v46 }
 0x45a   :  { %1045 = vmatmul.mubr.bf16.vlgmr.msra.gmra.mxu0 %v790_v47 }
 0x51a   :  { %v889_v49 = vpop.f32.mrf.mxu0 }
 0x51b   :  { %v890_v50 = vadd.f32 %v889_v49, %v81_v48 }
 0x51c   :  { %v1046_v51 = vpop.f32.mrf.mxu0 }
 0x51d   :  { %v895_v53 = vmax.f32 %v890_v50, 0.0 }
 0x51e   :  { %v892_v54 = vpop.f32.mrf.mxu0 }
 0x51f   :  { %v896_v55 = vmul.f32 %v895_v53, %v82_v52 }
 0x520   :  { %v1047_v56 = vpop.f32.mrf.mxu0 }
 0x521   :  { %v897_v57 = vsel %vm99_vm0, %v896_v55, 0.0 }
 0x522   :  { %898 = vadd.xlane.f32.xlu0 %v897_v57 }
 0x5ab   :  { %v899_v59 = vpop.xlane.xlu0 %898 }
 0x5ac   :  { %v902_v60 = vadd.f32 %v901_v58, %v899_v59 }
 0x5ae   :  { %v906_v61 = vrot.slane %v902_v60, %v1322_v2 }
 0x5b0   :  { %907 = vst [vmem:[#allocation11] sm:$0xff] %v906_v61 }
 0x5b1   :  { %1251 = shalt.err (!%p1248_p10)
}
 0x5b2   :  { %917 = dma.vmem_to_hbm [thread:$0]  %s915_s16, 128, %s1379_s5, [#allocation5]  }
 0x5b3   :  { %1266 = dma.done.wait [#allocation5], 128  }
 0x5b4   :  { %1267 = vsyncadd [#allocation5], 4294967168 }
 0x5b5   :  { %921 = vsyncpa [#allocation4], 1 }
 0x5b6   :  { %922 = vsyncpa [#allocation7], 1 }
 0x5b7   :  { %923 = vsyncpa [#allocation10], 1 }
 0x5b8   :  { %924 = vsyncpa [#allocation5], 1 }

</bundles_post_ra>
